<compile_context>
chip_gen: v6e
topology: v6e:2x2x1
jax: 0.10.0
libtpu: 0.0.40
codegen_flags: <defaults>
</compile_context>

<pallas_src>
import math
from functools import partial

import jax
import jax.numpy as jnp
from jax.experimental import pallas as pl
from jax.experimental.pallas import tpu as pltpu


def _round_up(x, m):
    return ((x + m - 1) // m) * m


def _plan_batch_tiling(batch, t_in, target_cols, max_b_tile=64):
    """Pick (#batches per grid step, padded batch, base multiple).

    Constraints:
      * b_tile * t_in (row count of the transposed-x0 tile) is a multiple of 16 so
        the tile is sublane aligned for both f32 and bf16 inputs.
      * b_tile <= max_b_tile bounds the per-batch Theta loop (code size).
      * Prefer the candidate with the least batch padding, then the largest tile.
    """
    base = math.lcm(t_in, 16) // t_in
    max_tile = min(max_b_tile, max(target_cols, base * t_in) // t_in)
    max_tile = max(base, (max_tile // base) * base)
    best = None
    c = base
    while c <= max_tile:
        padded = _round_up(max(batch, 1), c)
        key = (padded - batch, -c)
        if best is None or key < best[0]:
            best = (key, c, padded)
        c += base
    _, b_tile, b_padded = best
    return b_tile, b_padded, base


def _dgcn_fused_kernel(aqt_ref, aht_ref, x_ref, thetat_ref, bias_ref, out_ref,
                       terms_ref, *, orders, b_tile, t_in, activation, mxu_dtype):
    """One grid step processes `b_tile` whole batches.

    aqt_ref/aht_ref : (N_p, N_p)            A_q^T / A_h^T (mxu_dtype, grid-invariant)
    x_ref           : (b_tile*t_in, N_p)    transposed x0 rows, (batch, time) batch-major
    thetat_ref      : (C, M*t_in)           Theta regrouped (k = m*t_in + t), transposed
    bias_ref        : (C, 1)                f32
    out_ref         : (b_tile, C, N_p)      f32 (batch, channel, node) slabs
    terms_ref       : (b_tile, M*t_in, N_p) f32 VMEM scratch holding the diffusion terms
    """
    f32 = jnp.float32
    num_m = 2 * orders + 1
    n_p = aqt_ref.shape[0]

    def store_term(m, xt):
        # xt: (b_tile*t_in, N_p) f32.  Splitting the sublane dim on a t_in(=8) boundary
        # keeps the reshape layout-preserving; each batch gets an aligned (t_in, N_p)
        # slab at sublane offset m*t_in of its scratch slice.
        terms_ref[:, m * t_in:(m + 1) * t_in, :] = xt.reshape(b_tile, t_in, n_p)

    # ---- diffusion recursion (exact PyTorch semantics, incl. the x0/x1 carry across
    #      supports).  Recursion state + Chebyshev combine stay f32; MXU operands bf16.
    x0 = x_ref[...].astype(f32)
    store_term(0, x0)
    x0_cur = x0
    m = 1
    for s_ref in (aqt_ref, aht_ref):
        support_t = s_ref[...]                                     # (N_p, N_p)
        x1 = jnp.dot(x0_cur.astype(mxu_dtype), support_t,
                     preferred_element_type=f32)                   # == (A @ x)^T
        store_term(m, x1)
        m += 1
        for _ in range(2, orders + 1):
            x2 = 2.0 * jnp.dot(x1.astype(mxu_dtype), support_t,
                               preferred_element_type=f32) - x0_cur
            store_term(m, x2)
            m += 1
            x1, x0_cur = x2, x1
    assert m == num_m

    # ---- fused Theta GEMM + bias + activation: ONE K = M*t_in matmul per batch.
    #      Bounded static unroll (b_tile <= 64); each iteration is a single MXU matmul
    #      on aligned, contiguous operands (no lane slicing, no relayouts).
    theta_t = thetat_ref[...]                                      # (C, K)
    bias_v = bias_ref[...]                                         # (C, 1) f32
    for b in range(b_tile):
        rhs = terms_ref[b].astype(mxu_dtype)                       # (K, N_p)
        y = jnp.dot(theta_t, rhs, preferred_element_type=f32)      # (C, N_p)
        y = y + bias_v
        if activation == "relu":
            y = jnp.maximum(y, 0.0)
        elif activation == "linear":
            pass
        else:
            raise ValueError(f"Activation {activation} not supported.")
        out_ref[b] = y


def d_gcn_forward(X, A_q, A_h, Theta1, bias, *, orders, activation="relu",
                  target_cols=None, mxu_dtype=jnp.bfloat16):
    """Fused D_GCN forward.  X: (B, N, T) -> (B, N, C)."""
    if activation not in ("relu", "linear"):
        raise ValueError(f"Activation {activation} not supported.")
    B, N, T = X.shape
    M = 2 * orders + 1
    K = M * T
    assert Theta1.shape[0] == T * M, "Theta1 rows must equal in_channels * num_matrices"
    C = Theta1.shape[1]

    f32 = jnp.float32
    op_bytes = jnp.dtype(mxu_dtype).itemsize

    # Node dim padded to a sublane/lane friendly size; out_channels is NOT padded.
    N_p = _round_up(N, 128) if N >= 128 else _round_up(N, 8)

    # ---- generation-aware VMEM budget / tiling --------------------------------------
    try:
        vmem_cap = int(pltpu.get_tpu_info().vmem_capacity_bytes)
    except Exception:
        vmem_cap = 64 * 2**20                       # conservative (v7x per-core) fallback
    vmem_cap = max(vmem_cap, 32 * 2**20)
    if target_cols is None:
        # bigger row tiles on 128 MiB parts (v5e/v6e), smaller on 64 MiB (v7x)
        target_cols = 512 if vmem_cap >= 96 * 2**20 else 256

    b_tile, B_p, base = _plan_batch_tiling(B, T, target_cols)

    def _plan_bytes(bt):
        cols_ = bt * T
        resident = 2 * (2 * N_p * N_p * op_bytes + C * K * op_bytes + C * 4)
        x_blocks = 2 * cols_ * N_p * op_bytes       # double-buffered input tile
        out_blocks = 2 * bt * C * N_p * 4           # double-buffered output tile
        scratch = bt * K * N_p * 4                  # diffusion-term scratch
        live = 4 * cols_ * N_p * 4                  # x0 / x1 / x2 + matmul result (f32)
        return resident + x_blocks + out_blocks + scratch + live

    budget = int(0.80 * vmem_cap)
    while _plan_bytes(b_tile) > budget and b_tile > base:
        b_tile = max(base, (b_tile // 2 // base) * base)
    B_p = _round_up(max(B, 1), b_tile)
    cols = b_tile * T
    n_tiles = B_p // b_tile
    vmem_limit = int(min(max(int(1.25 * _plan_bytes(b_tile)) + (2 << 20), 32 * 2**20),
                         max(budget, 32 * 2**20)))

    # ---- operand preparation (bf16 MXU operands; f32 bias / accumulation) -----------
    # Transposed x0: row (b*T + t) of xT equals X[b, :, t]; zero-pad batches and nodes.
    Xp = jnp.zeros((B_p, N_p, T), f32).at[:B, :N, :].set(X.astype(f32))
    xT = jnp.transpose(Xp, (0, 2, 1)).reshape(B_p * T, N_p).astype(mxu_dtype)

    AqT = jnp.zeros((N_p, N_p), f32).at[:N, :N].set(A_q.astype(f32).T).astype(mxu_dtype)
    AhT = jnp.zeros((N_p, N_p), f32).at[:N, :N].set(A_h.astype(f32).T).astype(mxu_dtype)

    # Theta1 rows are (t, m)-ordered; regroup to k = m*T + t and transpose to (C, K).
    theta_k = jnp.transpose(Theta1.astype(f32).reshape(T, M, C), (1, 0, 2)).reshape(K, C)
    thetaT = jnp.transpose(theta_k).astype(mxu_dtype)               # (C, K)
    bias_col = bias.astype(f32).reshape(C, 1)

    flops = n_tiles * (2 * (2 * orders) * cols * N_p * N_p + 2 * b_tile * C * K * N_p)
    bytes_accessed = (2 * N_p * N_p * op_bytes + B_p * T * N_p * op_bytes
                      + C * K * op_bytes + C * 4 + B_p * C * N_p * 4)

    kernel = partial(_dgcn_fused_kernel, orders=orders, b_tile=b_tile, t_in=T,
                     activation=activation, mxu_dtype=mxu_dtype)

    def _call(single_buffer_residents):
        res_kw = dict(pipeline_mode=pl.Buffered(1)) if single_buffer_residents else {}
        in_specs = [
            pl.BlockSpec((N_p, N_p), lambda i: (0, 0), **res_kw),    # A_q^T  (resident)
            pl.BlockSpec((N_p, N_p), lambda i: (0, 0), **res_kw),    # A_h^T  (resident)
            pl.BlockSpec((cols, N_p), lambda i: (i, 0)),              # x0^T batch-row tile
            pl.BlockSpec((C, K), lambda i: (0, 0), **res_kw),         # Theta^T (resident)
            pl.BlockSpec((C, 1), lambda i: (0, 0), **res_kw),         # bias    (resident)
        ]
        return pl.pallas_call(
            kernel,
            out_shape=jax.ShapeDtypeStruct((B_p, C, N_p), f32),
            grid=(n_tiles,),
            in_specs=in_specs,
            out_specs=pl.BlockSpec((b_tile, C, N_p), lambda i: (i, 0, 0)),
            scratch_shapes=[pltpu.VMEM((b_tile, K, N_p), f32)],
            compiler_params=pltpu.CompilerParams(
                dimension_semantics=("parallel",),
                vmem_limit_bytes=vmem_limit),
            cost_estimate=pl.CostEstimate(flops=int(flops), transcendentals=0,
                                          bytes_accessed=int(bytes_accessed)),
        )(AqT, AhT, xT, thetaT, bias_col)

    # Grid-invariant operands want a single pipeline buffer; fall back to the default
    # double-buffered pipeline if this JAX / Mosaic version rejects pl.Buffered(1).
    try:
        out_p = jax.block_until_ready(_call(single_buffer_residents=True))
    except Exception:
        out_p = jax.block_until_ready(_call(single_buffer_residents=False))

    # TODO(synk): nn.Dropout is identity at inference; training-mode RNG dropout not implemented.
    # TODO(synk): very large graphs (N_p >= 2048) need an additional node-row grid axis so the
    #             resident supports fit VMEM (and to feed v7x's second TensorCore); not needed here.
    # (batch, C, node) -> (batch, node, channel): tiny XLA transpose of B*N*C elements.
    return jnp.transpose(out_p[:B, :, :N], (0, 2, 1))


def _reference_forward(X, A_q, A_h, Theta1, bias, *, orders, activation="relu",
                       operand_dtype=jnp.float32):
    """Pure-JAX replica of the PyTorch forward.

    With operand_dtype=f32 this is the exact module semantics; with bf16 it applies the
    same MXU-operand quantization as the kernel (f32 combine / accumulation everywhere).
    """
    f32 = jnp.float32
    od = operand_dtype
    B, N, T = X.shape
    M = 2 * orders + 1

    def mm(a, b):
        return jnp.dot(a.astype(od), b.astype(od), preferred_element_type=f32)

    x0 = jnp.transpose(X.astype(f32), (1, 2, 0)).reshape(N, T * B)
    x0 = x0.astype(od).astype(f32)                 # input is stored in od by the kernel
    terms = [x0]
    x0_cur = x0
    for support in (A_q.astype(f32), A_h.astype(f32)):
        x1 = mm(support, x0_cur)
        terms.append(x1)
        for _ in range(2, orders + 1):
            x2 = 2.0 * mm(support, x1) - x0_cur
            terms.append(x2)
            x1, x0_cur = x2, x1
    x = jnp.stack(terms, axis=0).reshape(M, N, T, B)
    x = jnp.transpose(x, (3, 1, 2, 0)).reshape(B, N, T * M)
    y = mm(x, Theta1.astype(f32)) + bias.astype(f32)
    if activation == "relu":
        y = jnp.maximum(y, 0.0)
    return y


if __name__ == "__main__":
    root = jax.random.PRNGKey(0)

    cases = [
        # toy shapes from the module docstring: X (batch, num_nodes, num_timesteps)
        dict(batch=2, num_nodes=16, in_channels=8, out_channels=32, orders=2,
             mxu_dtype=jnp.float32),    # exact f32 path vs the PyTorch-exact reference
        dict(batch=2, num_nodes=16, in_channels=8, out_channels=32, orders=2,
             mxu_dtype=jnp.bfloat16),   # bf16 MXU operands (production path)
        dict(batch=40, num_nodes=41, in_channels=8, out_channels=48, orders=3,
             mxu_dtype=jnp.bfloat16),   # padding + multi-step parallel grid
    ]

    for idx, cfg in enumerate(cases):
        key = jax.random.fold_in(root, idx)
        k_x, k_adj, k_theta, k_bias = jax.random.split(key, 4)
        B, N, T = cfg["batch"], cfg["num_nodes"], cfg["in_channels"]
        C, orders = cfg["out_channels"], cfg["orders"]
        M = 2 * orders + 1

        X = jax.random.normal(k_x, (B, N, T), dtype=jnp.float32)

        # Deterministic row-normalized random-walk matrices.
        adj = jax.random.uniform(k_adj, (N, N), dtype=jnp.float32)
        A_q = adj / jnp.sum(adj, axis=1, keepdims=True)
        A_h = adj.T / jnp.sum(adj.T, axis=1, keepdims=True)

        # Parameters initialized like reset_parameters(): uniform(-stdv, stdv).
        stdv = 1.0 / math.sqrt(C)
        Theta1 = jax.random.uniform(k_theta, (T * M, C), minval=-stdv, maxval=stdv,
                                    dtype=jnp.float32)
        bias = jax.random.uniform(k_bias, (C,), minval=-stdv, maxval=stdv,
                                  dtype=jnp.float32)

        out = d_gcn_forward(X, A_q, A_h, Theta1, bias, orders=orders,
                            activation="relu", mxu_dtype=cfg["mxu_dtype"])
        out = jax.block_until_ready(out)
        assert out.shape == (B, N, C)

        # Tight check against a reference with identical MXU operand precision.
        ref_same = _reference_forward(X, A_q, A_h, Theta1, bias, orders=orders,
                                      activation="relu", operand_dtype=cfg["mxu_dtype"])
        err = float(jnp.max(jnp.abs(out - ref_same)))
        assert jnp.allclose(out, ref_same, atol=2e-3, rtol=2e-3), \
            f"case {idx}: max err vs same-precision reference {err}"

        # Sanity check against the exact f32 PyTorch semantics.
        ref_f32 = _reference_forward(X, A_q, A_h, Theta1, bias, orders=orders,
                                     activation="relu", operand_dtype=jnp.float32)
        rel = float(jnp.linalg.norm(out - ref_f32) /
                    (jnp.linalg.norm(ref_f32) + 1e-12))
        tol = 1e-5 if cfg["mxu_dtype"] == jnp.float32 else 5e-2
        assert rel < tol, f"case {idx}: relative error vs f32 reference {rel}"

    print("KERNEL_OK")
</pallas_src>

<mosaic_0001>
module attributes {stable_mosaic.version = 11 : i64} {
  func.func @_dgcn_fused_kernel(%arg0: i32, %arg1: memref<16x16xf32, #tpu.memory_space<vmem>>, %arg2: memref<16x16xf32, #tpu.memory_space<vmem>>, %arg3: memref<16x16xf32, #tpu.memory_space<vmem>>, %arg4: memref<32x40xf32, #tpu.memory_space<vmem>>, %arg5: memref<32x1xf32, #tpu.memory_space<vmem>>, %arg6: memref<2x32x16xf32, #tpu.memory_space<vmem>>, %arg7: memref<2x40x16xf32, #tpu.memory_space<vmem>>) attributes {dimension_semantics = [#tpu.dimension_semantics<parallel>], iteration_bounds = array<i64: 1>, scalar_prefetch = 0 : i64, scratch_operands = 1 : i64, tpu.core_type = #tpu.core_type<tc>, window_params = [{pipeline_mode = #tpu.pipeline_mode<synchronous>, transform_indices = @transform_0, window_bounds = array<i64: 16, 16>}, {pipeline_mode = #tpu.pipeline_mode<synchronous>, transform_indices = @transform_1, window_bounds = array<i64: 16, 16>}, {transform_indices = @transform_2, window_bounds = array<i64: 16, 16>}, {pipeline_mode = #tpu.pipeline_mode<synchronous>, transform_indices = @transform_3, window_bounds = array<i64: 32, 40>}, {pipeline_mode = #tpu.pipeline_mode<synchronous>, transform_indices = @transform_4, window_bounds = array<i64: 32, 1>}, {transform_indices = @transform_5, window_bounds = array<i64: 2, 32, 16>}]} {
    %c0 = arith.constant 0 : index
    %c0_0 = arith.constant 0 : index
    %0 = vector.load %arg3[%c0, %c0_0] : memref<16x16xf32, #tpu.memory_space<vmem>>, vector<16x16xf32>
    %1 = vector.shape_cast %0 : vector<16x16xf32> to vector<2x8x16xf32>
    %c0_1 = arith.constant 0 : index
    %c0_2 = arith.constant 0 : index
    %c0_3 = arith.constant 0 : index
    %2 = vector.load %arg7[%c0_1, %c0_2, %c0_3] : memref<2x40x16xf32, #tpu.memory_space<vmem>>, vector<2x8x16xf32>
    tpu.vector_store %arg7[%c0_1, %c0_2, %c0_3], %1 {strides = array<i32>} : memref<2x40x16xf32, #tpu.memory_space<vmem>>, vector<2x8x16xf32>,
    %c0_4 = arith.constant 0 : index
    %c0_5 = arith.constant 0 : index
    %3 = vector.load %arg1[%c0_4, %c0_5] : memref<16x16xf32, #tpu.memory_space<vmem>>, vector<16x16xf32>
    %cst = arith.constant dense<0.000000e+00> : vector<16x16xf32>
    %4 = tpu.matmul %0, %3, %cst {dimension_numbers = #tpu.dot_dimension_numbers<[1], [0], [0], [1], [0, 0, 1, 1], [], []>} : vector<16x16xf32>, vector<16x16xf32>, vector<16x16xf32> -> vector<16x16xf32>
    %5 = vector.shape_cast %4 : vector<16x16xf32> to vector<2x8x16xf32>
    %c0_6 = arith.constant 0 : index
    %c8 = arith.constant 8 : index
    %c0_7 = arith.constant 0 : index
    %6 = vector.load %arg7[%c0_6, %c8, %c0_7] : memref<2x40x16xf32, #tpu.memory_space<vmem>>, vector<2x8x16xf32>
    tpu.vector_store %arg7[%c0_6, %c8, %c0_7], %5 {strides = array<i32>} : memref<2x40x16xf32, #tpu.memory_space<vmem>>, vector<2x8x16xf32>,
    %cst_8 = arith.constant dense<0.000000e+00> : vector<16x16xf32>
    %7 = tpu.matmul %4, %3, %cst_8 {dimension_numbers = #tpu.dot_dimension_numbers<[1], [0], [0], [1], [0, 0, 1, 1], [], []>} : vector<16x16xf32>, vector<16x16xf32>, vector<16x16xf32> -> vector<16x16xf32>
    %cst_9 = arith.constant 2.000000e+00 : f32
    %8 = vector.broadcast %cst_9 : f32 to vector<16x16xf32>
    %9 = arith.mulf %8, %7 : vector<16x16xf32>
    %10 = arith.subf %9, %0 : vector<16x16xf32>
    %11 = vector.shape_cast %10 : vector<16x16xf32> to vector<2x8x16xf32>
    %c0_10 = arith.constant 0 : index
    %c16 = arith.constant 16 : index
    %c0_11 = arith.constant 0 : index
    %12 = vector.load %arg7[%c0_10, %c16, %c0_11] : memref<2x40x16xf32, #tpu.memory_space<vmem>>, vector<2x8x16xf32>
    tpu.vector_store %arg7[%c0_10, %c16, %c0_11], %11 {strides = array<i32>} : memref<2x40x16xf32, #tpu.memory_space<vmem>>, vector<2x8x16xf32>,
    %c0_12 = arith.constant 0 : index
    %c0_13 = arith.constant 0 : index
    %13 = vector.load %arg2[%c0_12, %c0_13] : memref<16x16xf32, #tpu.memory_space<vmem>>, vector<16x16xf32>
    %cst_14 = arith.constant dense<0.000000e+00> : vector<16x16xf32>
    %14 = tpu.matmul %4, %13, %cst_14 {dimension_numbers = #tpu.dot_dimension_numbers<[1], [0], [0], [1], [0, 0, 1, 1], [], []>} : vector<16x16xf32>, vector<16x16xf32>, vector<16x16xf32> -> vector<16x16xf32>
    %15 = vector.shape_cast %14 : vector<16x16xf32> to vector<2x8x16xf32>
    %c0_15 = arith.constant 0 : index
    %c24 = arith.constant 24 : index
    %c0_16 = arith.constant 0 : index
    %16 = vector.load %arg7[%c0_15, %c24, %c0_16] : memref<2x40x16xf32, #tpu.memory_space<vmem>>, vector<2x8x16xf32>
    tpu.vector_store %arg7[%c0_15, %c24, %c0_16], %15 {strides = array<i32>} : memref<2x40x16xf32, #tpu.memory_space<vmem>>, vector<2x8x16xf32>,
    %cst_17 = arith.constant dense<0.000000e+00> : vector<16x16xf32>
    %17 = tpu.matmul %14, %13, %cst_17 {dimension_numbers = #tpu.dot_dimension_numbers<[1], [0], [0], [1], [0, 0, 1, 1], [], []>} : vector<16x16xf32>, vector<16x16xf32>, vector<16x16xf32> -> vector<16x16xf32>
    %cst_18 = arith.constant 2.000000e+00 : f32
    %18 = vector.broadcast %cst_18 : f32 to vector<16x16xf32>
    %19 = arith.mulf %18, %17 : vector<16x16xf32>
    %20 = arith.subf %19, %4 : vector<16x16xf32>
    %21 = vector.shape_cast %20 : vector<16x16xf32> to vector<2x8x16xf32>
    %c0_19 = arith.constant 0 : index
    %c32 = arith.constant 32 : index
    %c0_20 = arith.constant 0 : index
    %22 = vector.load %arg7[%c0_19, %c32, %c0_20] : memref<2x40x16xf32, #tpu.memory_space<vmem>>, vector<2x8x16xf32>
    tpu.vector_store %arg7[%c0_19, %c32, %c0_20], %21 {strides = array<i32>} : memref<2x40x16xf32, #tpu.memory_space<vmem>>, vector<2x8x16xf32>,
    %c0_21 = arith.constant 0 : index
    %c0_22 = arith.constant 0 : index
    %23 = vector.load %arg4[%c0_21, %c0_22] : memref<32x40xf32, #tpu.memory_space<vmem>>, vector<32x40xf32>
    %c0_23 = arith.constant 0 : index
    %c0_24 = arith.constant 0 : index
    %24 = vector.load %arg5[%c0_23, %c0_24] : memref<32x1xf32, #tpu.memory_space<vmem>>, vector<32x1xf32>
    %c0_25 = arith.constant 0 : index
    %c0_26 = arith.constant 0 : index
    %c0_27 = arith.constant 0 : index
    %25 = vector.load %arg7[%c0_25, %c0_26, %c0_27] : memref<2x40x16xf32, #tpu.memory_space<vmem>>, vector<1x40x16xf32>
    %26 = vector.shape_cast %25 : vector<1x40x16xf32> to vector<40x16xf32>
    %cst_28 = arith.constant dense<0.000000e+00> : vector<32x16xf32>
    %27 = tpu.matmul %23, %26, %cst_28 {dimension_numbers = #tpu.dot_dimension_numbers<[1], [0], [0], [1], [0, 0, 1, 1], [], []>} : vector<32x40xf32>, vector<40x16xf32>, vector<32x16xf32> -> vector<32x16xf32>
    %28 = vector.broadcast %24 : vector<32x1xf32> to vector<32x16xf32>
    %29 = arith.addf %27, %28 : vector<32x16xf32>
    %cst_29 = arith.constant 0.000000e+00 : f32
    %30 = vector.broadcast %cst_29 : f32 to vector<32x16xf32>
    %31 = arith.maximumf %29, %30 : vector<32x16xf32>
    %c0_30 = arith.constant 0 : index
    %c0_31 = arith.constant 0 : index
    %c0_32 = arith.constant 0 : index
    %32 = vector.load %arg6[%c0_30, %c0_31, %c0_32] : memref<2x32x16xf32, #tpu.memory_space<vmem>>, vector<1x32x16xf32>
    %33 = vector.shape_cast %32 : vector<1x32x16xf32> to vector<32x16xf32>
    %34 = vector.shape_cast %31 : vector<32x16xf32> to vector<1x32x16xf32>
    tpu.vector_store %arg6[%c0_30, %c0_31, %c0_32], %34 {strides = array<i32>} : memref<2x32x16xf32, #tpu.memory_space<vmem>>, vector<1x32x16xf32>,
    %c1 = arith.constant 1 : index
    %c0_33 = arith.constant 0 : index
    %c0_34 = arith.constant 0 : index
    %35 = vector.load %arg7[%c1, %c0_33, %c0_34] : memref<2x40x16xf32, #tpu.memory_space<vmem>>, vector<1x40x16xf32>
    %36 = vector.shape_cast %35 : vector<1x40x16xf32> to vector<40x16xf32>
    %cst_35 = arith.constant dense<0.000000e+00> : vector<32x16xf32>
    %37 = tpu.matmul %23, %36, %cst_35 {dimension_numbers = #tpu.dot_dimension_numbers<[1], [0], [0], [1], [0, 0, 1, 1], [], []>} : vector<32x40xf32>, vector<40x16xf32>, vector<32x16xf32> -> vector<32x16xf32>
    %38 = vector.broadcast %24 : vector<32x1xf32> to vector<32x16xf32>
    %39 = arith.addf %37, %38 : vector<32x16xf32>
    %cst_36 = arith.constant 0.000000e+00 : f32
    %40 = vector.broadcast %cst_36 : f32 to vector<32x16xf32>
    %41 = arith.maximumf %39, %40 : vector<32x16xf32>
    %c1_37 = arith.constant 1 : index
    %c0_38 = arith.constant 0 : index
    %c0_39 = arith.constant 0 : index
    %42 = vector.load %arg6[%c1_37, %c0_38, %c0_39] : memref<2x32x16xf32, #tpu.memory_space<vmem>>, vector<1x32x16xf32>
    %43 = vector.shape_cast %42 : vector<1x32x16xf32> to vector<32x16xf32>
    %44 = vector.shape_cast %41 : vector<32x16xf32> to vector<1x32x16xf32>
    tpu.vector_store %arg6[%c1_37, %c0_38, %c0_39], %44 {strides = array<i32>} : memref<2x32x16xf32, #tpu.memory_space<vmem>>, vector<1x32x16xf32>,
    return
  }
  func.func @transform_0(%arg0: i32) -> (i32, i32) {
    %c0_i32 = arith.constant 0 : i32
    %c0_i32_0 = arith.constant 0 : i32
    %c0_i32_1 = arith.constant 0 : i32
    return %c0_i32, %c0_i32_0 : i32, i32
  }
  func.func @transform_1(%arg0: i32) -> (i32, i32) {
    %c0_i32 = arith.constant 0 : i32
    %c0_i32_0 = arith.constant 0 : i32
    %c0_i32_1 = arith.constant 0 : i32
    return %c0_i32, %c0_i32_0 : i32, i32
  }
  func.func @transform_2(%arg0: i32) -> (i32, i32) {
    %c0_i32 = arith.constant 0 : i32
    %c0_i32_0 = arith.constant 0 : i32
    return %arg0, %c0_i32 : i32, i32
  }
  func.func @transform_3(%arg0: i32) -> (i32, i32) {
    %c0_i32 = arith.constant 0 : i32
    %c0_i32_0 = arith.constant 0 : i32
    %c0_i32_1 = arith.constant 0 : i32
    return %c0_i32, %c0_i32_0 : i32, i32
  }
  func.func @transform_4(%arg0: i32) -> (i32, i32) {
    %c0_i32 = arith.constant 0 : i32
    %c0_i32_0 = arith.constant 0 : i32
    %c0_i32_1 = arith.constant 0 : i32
    return %c0_i32, %c0_i32_0 : i32, i32
  }
  func.func @transform_5(%arg0: i32) -> (i32, i32, i32) {
    %c0_i32 = arith.constant 0 : i32
    %c0_i32_0 = arith.constant 0 : i32
    %c0_i32_1 = arith.constant 0 : i32
    return %arg0, %c0_i32, %c0_i32_0 : i32, i32, i32
  }
}

module attributes {stable_mosaic.version = 11 : i64} {
  func.func @_dgcn_fused_kernel(%arg0: i32, %arg1: memref<16x16xf32, #tpu.memory_space<vmem>>, %arg2: memref<16x16xf32, #tpu.memory_space<vmem>>, %arg3: memref<16x16xf32, #tpu.memory_space<vmem>>, %arg4: memref<32x40xf32, #tpu.memory_space<vmem>>, %arg5: memref<32x1xf32, #tpu.memory_space<vmem>>, %arg6: memref<2x32x16xf32, #tpu.memory_space<vmem>>, %arg7: memref<2x40x16xf32, #tpu.memory_space<vmem>>) attributes {dimension_semantics = [#tpu.dimension_semantics<parallel>], iteration_bounds = array<i64: 1>, scalar_prefetch = 0 : i64, scratch_operands = 1 : i64, tpu.core_type = #tpu.core_type<tc>, window_params = [{pipeline_mode = #tpu.pipeline_mode<synchronous>, transform_indices = @transform_0, window_bounds = array<i64: 16, 16>}, {pipeline_mode = #tpu.pipeline_mode<synchronous>, transform_indices = @transform_1, window_bounds = array<i64: 16, 16>}, {transform_indices = @transform_2, window_bounds = array<i64: 16, 16>}, {pipeline_mode = #tpu.pipeline_mode<synchronous>, transform_indices = @transform_3, window_bounds = array<i64: 32, 40>}, {pipeline_mode = #tpu.pipeline_mode<synchronous>, transform_indices = @transform_4, window_bounds = array<i64: 32, 1>}, {transform_indices = @transform_5, window_bounds = array<i64: 2, 32, 16>}]} {
    %c0 = arith.constant 0 : index
    %c0_0 = arith.constant 0 : index
    %0 = vector.load %arg3[%c0, %c0_0] : memref<16x16xf32, #tpu.memory_space<vmem>>, vector<16x16xf32>
    %1 = vector.shape_cast %0 : vector<16x16xf32> to vector<2x8x16xf32>
    %c0_1 = arith.constant 0 : index
    %c0_2 = arith.constant 0 : index
    %c0_3 = arith.constant 0 : index
    %2 = vector.load %arg7[%c0_1, %c0_2, %c0_3] : memref<2x40x16xf32, #tpu.memory_space<vmem>>, vector<2x8x16xf32>
    tpu.vector_store %arg7[%c0_1, %c0_2, %c0_3], %1 {strides = array<i32>} : memref<2x40x16xf32, #tpu.memory_space<vmem>>, vector<2x8x16xf32>,
    %c0_4 = arith.constant 0 : index
    %c0_5 = arith.constant 0 : index
    %3 = vector.load %arg1[%c0_4, %c0_5] : memref<16x16xf32, #tpu.memory_space<vmem>>, vector<16x16xf32>
    %cst = arith.constant dense<0.000000e+00> : vector<16x16xf32>
    %4 = tpu.matmul %0, %3, %cst {dimension_numbers = #tpu.dot_dimension_numbers<[1], [0], [0], [1], [0, 0, 1, 1], [], []>} : vector<16x16xf32>, vector<16x16xf32>, vector<16x16xf32> -> vector<16x16xf32>
    %5 = vector.shape_cast %4 : vector<16x16xf32> to vector<2x8x16xf32>
    %c0_6 = arith.constant 0 : index
    %c8 = arith.constant 8 : index
    %c0_7 = arith.constant 0 : index
    %6 = vector.load %arg7[%c0_6, %c8, %c0_7] : memref<2x40x16xf32, #tpu.memory_space<vmem>>, vector<2x8x16xf32>
    tpu.vector_store %arg7[%c0_6, %c8, %c0_7], %5 {strides = array<i32>} : memref<2x40x16xf32, #tpu.memory_space<vmem>>, vector<2x8x16xf32>,
    %cst_8 = arith.constant dense<0.000000e+00> : vector<16x16xf32>
    %7 = tpu.matmul %4, %3, %cst_8 {dimension_numbers = #tpu.dot_dimension_numbers<[1], [0], [0], [1], [0, 0, 1, 1], [], []>} : vector<16x16xf32>, vector<16x16xf32>, vector<16x16xf32> -> vector<16x16xf32>
    %cst_9 = arith.constant 2.000000e+00 : f32
    %8 = vector.broadcast %cst_9 : f32 to vector<16x16xf32>
    %9 = arith.mulf %8, %7 : vector<16x16xf32>
    %10 = arith.subf %9, %0 : vector<16x16xf32>
    %11 = vector.shape_cast %10 : vector<16x16xf32> to vector<2x8x16xf32>
    %c0_10 = arith.constant 0 : index
    %c16 = arith.constant 16 : index
    %c0_11 = arith.constant 0 : index
    %12 = vector.load %arg7[%c0_10, %c16, %c0_11] : memref<2x40x16xf32, #tpu.memory_space<vmem>>, vector<2x8x16xf32>
    tpu.vector_store %arg7[%c0_10, %c16, %c0_11], %11 {strides = array<i32>} : memref<2x40x16xf32, #tpu.memory_space<vmem>>, vector<2x8x16xf32>,
    %c0_12 = arith.constant 0 : index
    %c0_13 = arith.constant 0 : index
    %13 = vector.load %arg2[%c0_12, %c0_13] : memref<16x16xf32, #tpu.memory_space<vmem>>, vector<16x16xf32>
    %cst_14 = arith.constant dense<0.000000e+00> : vector<16x16xf32>
    %14 = tpu.matmul %4, %13, %cst_14 {dimension_numbers = #tpu.dot_dimension_numbers<[1], [0], [0], [1], [0, 0, 1, 1], [], []>} : vector<16x16xf32>, vector<16x16xf32>, vector<16x16xf32> -> vector<16x16xf32>
    %15 = vector.shape_cast %14 : vector<16x16xf32> to vector<2x8x16xf32>
    %c0_15 = arith.constant 0 : index
    %c24 = arith.constant 24 : index
    %c0_16 = arith.constant 0 : index
    %16 = vector.load %arg7[%c0_15, %c24, %c0_16] : memref<2x40x16xf32, #tpu.memory_space<vmem>>, vector<2x8x16xf32>
    tpu.vector_store %arg7[%c0_15, %c24, %c0_16], %15 {strides = array<i32>} : memref<2x40x16xf32, #tpu.memory_space<vmem>>, vector<2x8x16xf32>,
    %cst_17 = arith.constant dense<0.000000e+00> : vector<16x16xf32>
    %17 = tpu.matmul %14, %13, %cst_17 {dimension_numbers = #tpu.dot_dimension_numbers<[1], [0], [0], [1], [0, 0, 1, 1], [], []>} : vector<16x16xf32>, vector<16x16xf32>, vector<16x16xf32> -> vector<16x16xf32>
    %cst_18 = arith.constant 2.000000e+00 : f32
    %18 = vector.broadcast %cst_18 : f32 to vector<16x16xf32>
    %19 = arith.mulf %18, %17 : vector<16x16xf32>
    %20 = arith.subf %19, %4 : vector<16x16xf32>
    %21 = vector.shape_cast %20 : vector<16x16xf32> to vector<2x8x16xf32>
    %c0_19 = arith.constant 0 : index
    %c32 = arith.constant 32 : index
    %c0_20 = arith.constant 0 : index
    %22 = vector.load %arg7[%c0_19, %c32, %c0_20] : memref<2x40x16xf32, #tpu.memory_space<vmem>>, vector<2x8x16xf32>
    tpu.vector_store %arg7[%c0_19, %c32, %c0_20], %21 {strides = array<i32>} : memref<2x40x16xf32, #tpu.memory_space<vmem>>, vector<2x8x16xf32>,
    %c0_21 = arith.constant 0 : index
    %c0_22 = arith.constant 0 : index
    %23 = vector.load %arg4[%c0_21, %c0_22] : memref<32x40xf32, #tpu.memory_space<vmem>>, vector<32x40xf32>
    %c0_23 = arith.constant 0 : index
    %c0_24 = arith.constant 0 : index
    %24 = vector.load %arg5[%c0_23, %c0_24] : memref<32x1xf32, #tpu.memory_space<vmem>>, vector<32x1xf32>
    %c0_25 = arith.constant 0 : index
    %c0_26 = arith.constant 0 : index
    %c0_27 = arith.constant 0 : index
    %25 = vector.load %arg7[%c0_25, %c0_26, %c0_27] : memref<2x40x16xf32, #tpu.memory_space<vmem>>, vector<1x40x16xf32>
    %26 = vector.shape_cast %25 : vector<1x40x16xf32> to vector<40x16xf32>
    %cst_28 = arith.constant dense<0.000000e+00> : vector<32x16xf32>
    %27 = tpu.matmul %23, %26, %cst_28 {dimension_numbers = #tpu.dot_dimension_numbers<[1], [0], [0], [1], [0, 0, 1, 1], [], []>} : vector<32x40xf32>, vector<40x16xf32>, vector<32x16xf32> -> vector<32x16xf32>
    %28 = vector.broadcast %24 : vector<32x1xf32> to vector<32x16xf32>
    %29 = arith.addf %27, %28 : vector<32x16xf32>
    %cst_29 = arith.constant 0.000000e+00 : f32
    %30 = vector.broadcast %cst_29 : f32 to vector<32x16xf32>
    %31 = arith.maximumf %29, %30 : vector<32x16xf32>
    %c0_30 = arith.constant 0 : index
    %c0_31 = arith.constant 0 : index
    %c0_32 = arith.constant 0 : index
    %32 = vector.load %arg6[%c0_30, %c0_31, %c0_32] : memref<2x32x16xf32, #tpu.memory_space<vmem>>, vector<1x32x16xf32>
    %33 = vector.shape_cast %32 : vector<1x32x16xf32> to vector<32x16xf32>
    %34 = vector.shape_cast %31 : vector<32x16xf32> to vector<1x32x16xf32>
    tpu.vector_store %arg6[%c0_30, %c0_31, %c0_32], %34 {strides = array<i32>} : memref<2x32x16xf32, #tpu.memory_space<vmem>>, vector<1x32x16xf32>,
    %c1 = arith.constant 1 : index
    %c0_33 = arith.constant 0 : index
    %c0_34 = arith.constant 0 : index
    %35 = vector.load %arg7[%c1, %c0_33, %c0_34] : memref<2x40x16xf32, #tpu.memory_space<vmem>>, vector<1x40x16xf32>
    %36 = vector.shape_cast %35 : vector<1x40x16xf32> to vector<40x16xf32>
    %cst_35 = arith.constant dense<0.000000e+00> : vector<32x16xf32>
    %37 = tpu.matmul %23, %36, %cst_35 {dimension_numbers = #tpu.dot_dimension_numbers<[1], [0], [0], [1], [0, 0, 1, 1], [], []>} : vector<32x40xf32>, vector<40x16xf32>, vector<32x16xf32> -> vector<32x16xf32>
    %38 = vector.broadcast %24 : vector<32x1xf32> to vector<32x16xf32>
    %39 = arith.addf %37, %38 : vector<32x16xf32>
    %cst_36 = arith.constant 0.000000e+00 : f32
    %40 = vector.broadcast %cst_36 : f32 to vector<32x16xf32>
    %41 = arith.maximumf %39, %40 : vector<32x16xf32>
    %c1_37 = arith.constant 1 : index
    %c0_38 = arith.constant 0 : index
    %c0_39 = arith.constant 0 : index
    %42 = vector.load %arg6[%c1_37, %c0_38, %c0_39] : memref<2x32x16xf32, #tpu.memory_space<vmem>>, vector<1x32x16xf32>
    %43 = vector.shape_cast %42 : vector<1x32x16xf32> to vector<32x16xf32>
    %44 = vector.shape_cast %41 : vector<32x16xf32> to vector<1x32x16xf32>
    tpu.vector_store %arg6[%c1_37, %c0_38, %c0_39], %44 {strides = array<i32>} : memref<2x32x16xf32, #tpu.memory_space<vmem>>, vector<1x32x16xf32>,
    return
  }
  func.func @transform_0(%arg0: i32) -> (i32, i32) {
    %c0_i32 = arith.constant 0 : i32
    %c0_i32_0 = arith.constant 0 : i32
    %c0_i32_1 = arith.constant 0 : i32
    return %c0_i32, %c0_i32_0 : i32, i32
  }
  func.func @transform_1(%arg0: i32) -> (i32, i32) {
    %c0_i32 = arith.constant 0 : i32
    %c0_i32_0 = arith.constant 0 : i32
    %c0_i32_1 = arith.constant 0 : i32
    return %c0_i32, %c0_i32_0 : i32, i32
  }
  func.func @transform_2(%arg0: i32) -> (i32, i32) {
    %c0_i32 = arith.constant 0 : i32
    %c0_i32_0 = arith.constant 0 : i32
    return %arg0, %c0_i32 : i32, i32
  }
  func.func @transform_3(%arg0: i32) -> (i32, i32) {
    %c0_i32 = arith.constant 0 : i32
    %c0_i32_0 = arith.constant 0 : i32
    %c0_i32_1 = arith.constant 0 : i32
    return %c0_i32, %c0_i32_0 : i32, i32
  }
  func.func @transform_4(%arg0: i32) -> (i32, i32) {
    %c0_i32 = arith.constant 0 : i32
    %c0_i32_0 = arith.constant 0 : i32
    %c0_i32_1 = arith.constant 0 : i32
    return %c0_i32, %c0_i32_0 : i32, i32
  }
  func.func @transform_5(%arg0: i32) -> (i32, i32, i32) {
    %c0_i32 = arith.constant 0 : i32
    %c0_i32_0 = arith.constant 0 : i32
    %c0_i32_1 = arith.constant 0 : i32
    return %arg0, %c0_i32, %c0_i32_0 : i32, i32, i32
  }
}

</mosaic_0001>

<bundles_post_ra>
// kernel: tpu_custom_call.1
= control target key start
LH: loop header
LB: loop body
LE: loop exit
PB: predicated region body
PF: predicated region fallthrough
CT: control target
= control target key end

     0   :  { %10 = vsyncpa [#allocation4], 0  ;;  %s962_s0 = inlined_call_operand.hbm [shape: f32[16,16], index: 0, kind: input, shape index: {}]   ;;  %s963_s1 = inlined_call_operand.hbm [shape: f32[16,16], index: 1, kind: input, shape index: {}]   ;;  %s964_s2 = inlined_call_operand.hbm [shape: f32[16,16], index: 2, kind: input, shape index: {}]   ;;  %s965_s3 = inlined_call_operand.vmem [shape: f32[32,40], index: 3, kind: input, shape index: {}]   ;;  %s966_s4 = inlined_call_operand.vmem [shape: f32[32,1], index: 4, kind: input, shape index: {}]   ;;  %s967_s5 = inlined_call_operand.vmem [shape: f32[2,32,16], index: 5, kind: output, shape index: {}]  }
   0x1   :  { %11 = vsyncpa [#allocation6], 0  ;;  %s835_s18 = smov [#allocation5]   ;;  %s836_s20 = smov [#allocation3]  }
   0x2   :  { %s29_s19 = sshll.u32 %s835_s18, 4  ;;  %s17_s21 = sshll.u32 %s836_s20, 4  ;;  %s30_s19 = int_to_ptr.vmem [resolvable:$true] %s29_s19  ;;  %s18_s21 = int_to_ptr.vmem [resolvable:$true] %s17_s21 }
   0x3   :  { %s779_s22 = scalar_lea.vmem %s30_s19, 256  ;;  %p784_p1 = scmp.lt.s32.totalorder %s30_s19, %s30_s19 }
   0x4   :  { %p780_p0 = scmp.ne.s32.totalorder %s30_s19, %s779_s22  ;;  %p785_p2 = scmp.lt.s32.totalorder %s779_s22, %s779_s22 }
   0x6   :  { %p786_p3 = por %p785_p2, %p784_p1 }
   0x8   :  { %p787_p4 = pnand %p786_p3, %p780_p0 }
   0xa   :  { %790 = shalt.err (!%p787_p4)
}
   0xb   :  { %s837_s23 = smov 128   ;;  %s838_s24 = smov 8  }
   0xc   :  { %35 = dma.hbm_to_vmem [thread:$0]  %s963_s1, 256, %s30_s19, [#allocation6], %s837_s23, %s837_s23, %s838_s24  }
   0xd   :  { %s799_s27 = scalar_lea.vmem %s18_s21, 256  ;;  %p804_p6 = scmp.lt.s32.totalorder %s18_s21, %s18_s21 }
   0xe   :  { %p800_p5 = scmp.ne.s32.totalorder %s18_s21, %s799_s27  ;;  %p805_p7 = scmp.lt.s32.totalorder %s799_s27, %s799_s27 }
  0x10   :  { %p806_p8 = por %p805_p7, %p804_p6 }
  0x12   :  { %p807_p9 = pnand %p806_p8, %p800_p5 }
  0x14   :  { %810 = shalt.err (!%p807_p9)
}
  0x15   :  { %23 = dma.hbm_to_vmem [thread:$0]  %s962_s0, 256, %s18_s21, [#allocation4], %s837_s23, %s837_s23, %s838_s24  }
  0x16   :  { %s839_s30 = smov [#allocation7]  }
  0x17   :  { %s41_s6 = sshll.u32 %s839_s30, 4  ;;  %s42_s6 = int_to_ptr.vmem [resolvable:$true] %s41_s6 }
  0x18   :  { %s819_s7 = scalar_lea.vmem %s42_s6, 256  ;;  %p824_p11 = scmp.lt.s32.totalorder %s42_s6, %s42_s6 }
  0x19   :  { %p820_p10 = scmp.ne.s32.totalorder %s42_s6, %s819_s7  ;;  %p825_p12 = scmp.lt.s32.totalorder %s819_s7, %s819_s7 }
  0x1b   :  { %p826_p13 = por %p825_p12, %p824_p11 }
  0x1d   :  { %p827_p0 = pnand %p826_p13, %p820_p10 }
  0x1f   :  { %830 = shalt.err (!%p827_p0)
}
  0x20   :  { %47 = dma.hbm_to_vmem [thread:$0]  %s964_s2, 256, %s42_s6, [#allocation6], %s837_s23, %s837_s23, %s838_s24  }
  0x21   :  { %831 = dma.done.wait [#allocation4], 256  }
  0x22   :  { %832 = vsyncadd [#allocation4], 4294967040 }
  0x23   :  { %833 = dma.done.wait [#allocation6], 512  }
  0x24   :  { %834 = vsyncadd [#allocation6], 4294966784  ;;  %vm63_vm0 = vcmask 130048   ;;  %v67_v0 = vld [vmem:[#allocation3 + $0x8] sm:$0xff]  ;;  %v66_v1 = vld [vmem:[#allocation3] sm:$0xff]  ;;  %vm437_vm1 = vcmask 326656  }
  0x25   :  { %v61_v2 = vld [vmem:[#allocation7] sm:$0xff]  ;;  %703 = vmatprep.subr.mxu0 %v67_v0  ;;  %v62_v3 = vld [vmem:[#allocation7 + $0x8] sm:$0xff]  ;;  %v239_v4 = vld [vmem:[#allocation5 + $0x8] sm:$0xff]  ;;  %710 = vmatprep.subr.mxu1 %v67_v0  ;;  %v840_v19 = vmov 0  }
  0x26   :  { %64 = vst.msk [vmem:[#allocation2] sm:$0xff] %vm63_vm0, %v61_v2  ;;  %707 = vmatprep.mubr.msk.f32.mxu0 %vm63_vm0, %v61_v2  ;;  %704 = vmatpush3.msra.mxu0 %v67_v0  ;;  %65 = vst.msk [vmem:[#allocation2 + $0x28] sm:$0xff] %vm63_vm0, %v62_v3  ;;  %v238_v5 = vld [vmem:[#allocation5] sm:$0xff]  ;;  %v410_v18 = vld [vmem:[%s966_s4 + $0x10] sm:$0xff] }
  0x27   :  { %705 = vmatprep.subr.mxu0 %v66_v1  ;;  %711 = vmatpush3.msra.mxu1 %v67_v0  ;;  %v404_v16 = vld [vmem:[%s965_s3] sm:$0xff]  ;;  %v409_v20 = vld [vmem:[%s966_s4 + $0x8] sm:$0xff]  ;;  %v411_v21 = vld [vmem:[%s966_s4 + $0x18] sm:$0xff] }
  0x28   :  { %706 = vmatpush3.msra.mxu0 %v66_v1  ;;  %712 = vmatprep.subr.mxu1 %v66_v1  ;;  %v408_v17 = vld [vmem:[%s966_s4] sm:$0xff]  ;;  %v405_v38 = vld [vmem:[%s965_s3 + $0x8] sm:$0xff]  ;;  %v406_v39 = vld [vmem:[%s965_s3 + $0x10] sm:$0xff] }
  0x29   :  { %708 = vmatmul.mubr.msk.f32.vlgmr.msra.gmra.mxu0 %vm63_vm0, %v62_v3  ;;  %717 = vmatprep.subr.mxu0 %v239_v4  ;;  %v407_v40 = vld [vmem:[%s965_s3 + $0x18] sm:$0xff] }
  0x2a   :  { %718 = vmatpush3.msra.mxu0 %v239_v4  ;;  %713 = vmatpush3.msra.mxu1 %v66_v1 }
  0x2b   :  { %724 = vmatprep.subr.mxu1 %v239_v4  ;;  %719 = vmatprep.subr.mxu0 %v238_v5 }
  0x2c   :  { %720 = vmatpush3.msra.mxu0 %v238_v5  ;;  %769 = vset.pattern.permute.xlu0 %v840_v19 }
  0x2d   :  { %770 = vset.pattern.permute.xlu1 %v840_v19  ;;  %419 = vperm.xlu0 %769, %v408_v17   ;;  %v544_v35 = vld [vmem:[#allocation2 + $0x28] sm:$0xff]  ;;  %v412_v37 = vld [vmem:[#allocation2] sm:$0xff] }
  0x2e   :  { %429 = vperm.xlu1 %770, %v410_v18  }
  0x31   :  { %424 = vperm.xlu0 %769, %v409_v20  }
  0x32   :  { %434 = vperm.xlu1 %770, %v411_v21  }
  0xa8   :  { %v420_v41 = vpop.permute.xlu0 %419 }
  0xa9   :  { %v430_v42 = vpop.permute.xlu1 %429 }
  0xac   :  { %v425_v43 = vpop.permute.xlu0 %424 }
  0xad   :  { %v435_v46 = vpop.permute.xlu1 %434 }
  0xe9   :  { %v709_v6 = vpop.f32.mrf.mxu0 }
  0xea   :  { %150 = vst.msk [vmem:[#allocation2 + $0x30] sm:$0xff] %vm63_vm0, %v709_v6 }
  0xeb   :  { %v140_v7 = vpop.f32.mrf.mxu0 }
  0xec   :  { %149 = vst.msk [vmem:[#allocation2 + $0x8] sm:$0xff] %vm63_vm0, %v140_v7  ;;  %714 = vmatprep.mubr.msk.f32.mxu1 %vm63_vm0, %v140_v7  ;;  %721 = vmatprep.mubr.msk.f32.mxu0 %vm63_vm0, %v140_v7 }
  0xed   :  { %715 = vmatmul.mubr.msk.f32.vlgmr.msra.gmra.mxu1 %vm63_vm0, %v709_v6  ;;  %722 = vmatmul.mubr.msk.f32.vlgmr.msra.gmra.mxu0 %vm63_vm0, %v709_v6 }
  0xee   :  { %725 = vmatpush3.msra.mxu1 %v239_v4  ;;  %741 = vmatprep.mubr.msk.f32.mxu0 %vm437_vm1, %v404_v16 }
  0xef   :  { %726 = vmatprep.subr.mxu1 %v238_v5 }
  0xf0   :  { %727 = vmatpush3.msra.mxu1 %v238_v5 }
  0xf1   :  { %v545_v34 = vld [vmem:[#allocation2 + $0x30] sm:$0xff] }
  0xf3   :  { %v413_v36 = vld [vmem:[#allocation2 + $0x8] sm:$0xff] }
 0x1ad   :  { %v716_v8 = vpop.f32.mrf.mxu1  ;;  %v723_v9 = vpop.f32.mrf.mxu0 }
 0x1ae   :  { %v233_v10 = vmul.f32 2.0, %v716_v8  ;;  %316 = vst.msk [vmem:[#allocation2 + $0x40] sm:$0xff] %vm63_vm0, %v723_v9 }
 0x1af   :  { %v223_v11 = vpop.f32.mrf.mxu1  ;;  %v306_v12 = vpop.f32.mrf.mxu0 }
 0x1b0   :  { %v235_v13 = vsub.f32 %v233_v10, %v62_v3  ;;  %v232_v14 = vmul.f32 2.0, %v223_v11  ;;  %315 = vst.msk [vmem:[#allocation2 + $0x18] sm:$0xff] %vm63_vm0, %v306_v12  ;;  %728 = vmatprep.mubr.msk.f32.mxu1 %vm63_vm0, %v306_v12 }
 0x1b1   :  { %729 = vmatmul.mubr.msk.f32.vlgmr.msra.gmra.mxu1 %vm63_vm0, %v723_v9 }
 0x1b2   :  { %237 = vst.msk [vmem:[#allocation2 + $0x38] sm:$0xff] %vm63_vm0, %v235_v13  ;;  %v234_v15 = vsub.f32 %v232_v14, %v61_v2  ;;  %757 = vmatprep.mubr.msk.f32.mxu1 %vm437_vm1, %v404_v16 }
 0x1b4   :  { %236 = vst.msk [vmem:[#allocation2 + $0x10] sm:$0xff] %vm63_vm0, %v234_v15 }
 0x1b5   :  { %v547_v30 = vld [vmem:[#allocation2 + $0x40] sm:$0xff] }
 0x1b7   :  { %v415_v31 = vld [vmem:[#allocation2 + $0x18] sm:$0xff] }
 0x1b9   :  { %v546_v32 = vld [vmem:[#allocation2 + $0x38] sm:$0xff] }
 0x1bb   :  { %v414_v33 = vld [vmem:[#allocation2 + $0x10] sm:$0xff] }
 0x271   :  { %v730_v22 = vpop.f32.mrf.mxu1 }
 0x272   :  { %v399_v23 = vmul.f32 2.0, %v730_v22 }
 0x273   :  { %v389_v24 = vpop.f32.mrf.mxu1 }
 0x274   :  { %v401_v25 = vsub.f32 %v399_v23, %v709_v6  ;;  %v398_v26 = vmul.f32 2.0, %v389_v24 }
 0x276   :  { %403 = vst.msk [vmem:[#allocation2 + $0x48] sm:$0xff] %vm63_vm0, %v401_v25  ;;  %v400_v27 = vsub.f32 %v398_v26, %v140_v7 }
 0x278   :  { %402 = vst.msk [vmem:[#allocation2 + $0x20] sm:$0xff] %vm63_vm0, %v400_v27 }
 0x27d   :  { %v548_v28 = vld [vmem:[#allocation2 + $0x48] sm:$0xff] }
 0x27e   :  { %747 = vmatprep.subr.mxu1 %v548_v28 }
 0x27f   :  { %748 = vmatpush3.msra.mxu1 %v548_v28  ;;  %v416_v29 = vld [vmem:[#allocation2 + $0x20] sm:$0xff] }
 0x280   :  { %731 = vmatprep.subr.mxu0 %v416_v29  ;;  %749 = vmatprep.subr.mxu1 %v547_v30 }
 0x281   :  { %732 = vmatpush3.msra.mxu0 %v416_v29  ;;  %750 = vmatpush3.msra.mxu1 %v547_v30 }
 0x282   :  { %733 = vmatprep.subr.mxu0 %v415_v31  ;;  %751 = vmatprep.subr.mxu1 %v546_v32 }
 0x283   :  { %734 = vmatpush3.msra.mxu0 %v415_v31  ;;  %752 = vmatpush3.msra.mxu1 %v546_v32 }
 0x284   :  { %735 = vmatprep.subr.mxu0 %v414_v33  ;;  %753 = vmatprep.subr.mxu1 %v545_v34 }
 0x285   :  { %736 = vmatpush3.msra.mxu0 %v414_v33  ;;  %754 = vmatpush3.msra.mxu1 %v545_v34 }
 0x286   :  { %737 = vmatprep.subr.mxu0 %v413_v36  ;;  %755 = vmatprep.subr.mxu1 %v544_v35 }
 0x287   :  { %738 = vmatpush3.msra.mxu0 %v413_v36  ;;  %756 = vmatpush3.msra.mxu1 %v544_v35 }
 0x288   :  { %739 = vmatprep.subr.mxu0 %v412_v37  ;;  %758 = vmatmul.mubr.msk.f32.vlgmr.msra.gmra.mxu1 %vm437_vm1, %v405_v38 }
 0x289   :  { %740 = vmatpush3.msra.mxu0 %v412_v37  ;;  %760 = vmatprep.mubr.msk.f32.mxu1 %vm437_vm1, %v406_v39 }
 0x28a   :  { %742 = vmatmul.mubr.msk.f32.vlgmr.msra.gmra.mxu0 %vm437_vm1, %v405_v38 }
 0x28b   :  { %744 = vmatprep.mubr.msk.f32.mxu0 %vm437_vm1, %v406_v39 }
 0x28c   :  { %761 = vmatmul.mubr.msk.f32.gmra.mxu1 %vm437_vm1, %v407_v40 }
 0x28e   :  { %745 = vmatmul.mubr.msk.f32.gmra.mxu0 %vm437_vm1, %v407_v40 }
 0x348   :  { %v759_v44 = vpop.f32.mrf.mxu1 }
 0x349   :  { %v621_v45 = vadd.f32 %v759_v44, %v425_v43 }
 0x34a   :  { %v743_v47 = vpop.f32.mrf.mxu0  ;;  %v615_v48 = vpop.f32.mrf.mxu1 }
 0x34b   :  { %v635_v49 = vmax.f32 %v621_v45, 0.0  ;;  %v522_v50 = vadd.f32 %v743_v47, %v425_v43  ;;  %v616_v51 = vadd.f32 %v615_v48, %v420_v41 }
 0x34c   :  { %v516_v52 = vpop.f32.mrf.mxu0  ;;  %v762_v53 = vpop.f32.mrf.mxu1 }
 0x34d   :  { %666 = vst.msk [vmem:[%s967_s5 + $0x28] sm:$0xff] %vm63_vm0, %v635_v49  ;;  %v536_v54 = vmax.f32 %v522_v50, 0.0  ;;  %v634_v55 = vmax.f32 %v616_v51, 0.0  ;;  %v517_v56 = vadd.f32 %v516_v52, %v420_v41  ;;  %v631_v57 = vadd.f32 %v762_v53, %v435_v46 }
 0x34e   :  { %v746_v58 = vpop.f32.mrf.mxu0  ;;  %v625_v59 = vpop.f32.mrf.mxu1 }
 0x34f   :  { %540 = vst.msk [vmem:[%s967_s5 + $0x8] sm:$0xff] %vm63_vm0, %v536_v54  ;;  %665 = vst.msk [vmem:[%s967_s5 + $0x20] sm:$0xff] %vm63_vm0, %v634_v55  ;;  %v535_v60 = vmax.f32 %v517_v56, 0.0  ;;  %v637_v61 = vmax.f32 %v631_v57, 0.0  ;;  %v532_v62 = vadd.f32 %v746_v58, %v435_v46  ;;  %v626_v63 = vadd.f32 %v625_v59, %v430_v42 }
 0x350   :  { %v526_v0 = vpop.f32.mrf.mxu0 }
 0x351   :  { %539 = vst.msk [vmem:[%s967_s5] sm:$0xff] %vm63_vm0, %v535_v60  ;;  %668 = vst.msk [vmem:[%s967_s5 + $0x38] sm:$0xff] %vm63_vm0, %v637_v61  ;;  %v538_v1 = vmax.f32 %v532_v62, 0.0  ;;  %v636_v2 = vmax.f32 %v626_v63, 0.0  ;;  %v527_v3 = vadd.f32 %v526_v0, %v430_v42 }
 0x353   :  { %542 = vst.msk [vmem:[%s967_s5 + $0x18] sm:$0xff] %vm63_vm0, %v538_v1  ;;  %667 = vst.msk [vmem:[%s967_s5 + $0x30] sm:$0xff] %vm63_vm0, %v636_v2  ;;  %v537_v4 = vmax.f32 %v527_v3, 0.0 }
 0x355   :  { %541 = vst.msk [vmem:[%s967_s5 + $0x10] sm:$0xff] %vm63_vm0, %v537_v4 }
 0x356   :  { %647 = vsyncpa [#allocation4], 1 }
 0x357   :  { %648 = vsyncpa [#allocation6], 1 }

// kernel: tpu_custom_call.1
= control target key start
LH: loop header
LB: loop body
LE: loop exit
PB: predicated region body
PF: predicated region fallthrough
CT: control target
= control target key end

     0   :  { %10 = vsyncpa [#allocation4], 0  ;;  %s962_s0 = inlined_call_operand.hbm [shape: f32[16,16], index: 0, kind: input, shape index: {}]   ;;  %s963_s1 = inlined_call_operand.hbm [shape: f32[16,16], index: 1, kind: input, shape index: {}]   ;;  %s964_s2 = inlined_call_operand.hbm [shape: f32[16,16], index: 2, kind: input, shape index: {}]   ;;  %s965_s3 = inlined_call_operand.vmem [shape: f32[32,40], index: 3, kind: input, shape index: {}]   ;;  %s966_s4 = inlined_call_operand.vmem [shape: f32[32,1], index: 4, kind: input, shape index: {}]   ;;  %s967_s5 = inlined_call_operand.vmem [shape: f32[2,32,16], index: 5, kind: output, shape index: {}]  }
   0x1   :  { %11 = vsyncpa [#allocation6], 0  ;;  %s835_s18 = smov [#allocation5]   ;;  %s836_s20 = smov [#allocation3]  }
   0x2   :  { %s29_s19 = sshll.u32 %s835_s18, 4  ;;  %s17_s21 = sshll.u32 %s836_s20, 4  ;;  %s30_s19 = int_to_ptr.vmem [resolvable:$true] %s29_s19  ;;  %s18_s21 = int_to_ptr.vmem [resolvable:$true] %s17_s21 }
   0x3   :  { %s779_s22 = scalar_lea.vmem %s30_s19, 256  ;;  %p784_p1 = scmp.lt.s32.totalorder %s30_s19, %s30_s19 }
   0x4   :  { %p780_p0 = scmp.ne.s32.totalorder %s30_s19, %s779_s22  ;;  %p785_p2 = scmp.lt.s32.totalorder %s779_s22, %s779_s22 }
   0x6   :  { %p786_p3 = por %p785_p2, %p784_p1 }
   0x8   :  { %p787_p4 = pnand %p786_p3, %p780_p0 }
   0xa   :  { %790 = shalt.err (!%p787_p4)
}
   0xb   :  { %s837_s23 = smov 128   ;;  %s838_s24 = smov 8  }
   0xc   :  { %35 = dma.hbm_to_vmem [thread:$0]  %s963_s1, 256, %s30_s19, [#allocation6], %s837_s23, %s837_s23, %s838_s24  }
   0xd   :  { %s799_s27 = scalar_lea.vmem %s18_s21, 256  ;;  %p804_p6 = scmp.lt.s32.totalorder %s18_s21, %s18_s21 }
   0xe   :  { %p800_p5 = scmp.ne.s32.totalorder %s18_s21, %s799_s27  ;;  %p805_p7 = scmp.lt.s32.totalorder %s799_s27, %s799_s27 }
  0x10   :  { %p806_p8 = por %p805_p7, %p804_p6 }
  0x12   :  { %p807_p9 = pnand %p806_p8, %p800_p5 }
  0x14   :  { %810 = shalt.err (!%p807_p9)
}
  0x15   :  { %23 = dma.hbm_to_vmem [thread:$0]  %s962_s0, 256, %s18_s21, [#allocation4], %s837_s23, %s837_s23, %s838_s24  }
  0x16   :  { %s839_s30 = smov [#allocation7]  }
  0x17   :  { %s41_s6 = sshll.u32 %s839_s30, 4  ;;  %s42_s6 = int_to_ptr.vmem [resolvable:$true] %s41_s6 }
  0x18   :  { %s819_s7 = scalar_lea.vmem %s42_s6, 256  ;;  %p824_p11 = scmp.lt.s32.totalorder %s42_s6, %s42_s6 }
  0x19   :  { %p820_p10 = scmp.ne.s32.totalorder %s42_s6, %s819_s7  ;;  %p825_p12 = scmp.lt.s32.totalorder %s819_s7, %s819_s7 }
  0x1b   :  { %p826_p13 = por %p825_p12, %p824_p11 }
  0x1d   :  { %p827_p0 = pnand %p826_p13, %p820_p10 }
  0x1f   :  { %830 = shalt.err (!%p827_p0)
}
  0x20   :  { %47 = dma.hbm_to_vmem [thread:$0]  %s964_s2, 256, %s42_s6, [#allocation6], %s837_s23, %s837_s23, %s838_s24  }
  0x21   :  { %831 = dma.done.wait [#allocation4], 256  }
  0x22   :  { %832 = vsyncadd [#allocation4], 4294967040 }
  0x23   :  { %833 = dma.done.wait [#allocation6], 512  }
  0x24   :  { %834 = vsyncadd [#allocation6], 4294966784  ;;  %vm63_vm0 = vcmask 130048   ;;  %v67_v0 = vld [vmem:[#allocation3 + $0x8] sm:$0xff]  ;;  %v66_v1 = vld [vmem:[#allocation3] sm:$0xff]  ;;  %vm437_vm1 = vcmask 326656  }
  0x25   :  { %v61_v2 = vld [vmem:[#allocation7] sm:$0xff]  ;;  %703 = vmatprep.subr.mxu0 %v67_v0  ;;  %v62_v3 = vld [vmem:[#allocation7 + $0x8] sm:$0xff]  ;;  %v239_v4 = vld [vmem:[#allocation5 + $0x8] sm:$0xff]  ;;  %710 = vmatprep.subr.mxu1 %v67_v0  ;;  %v840_v19 = vmov 0  }
  0x26   :  { %64 = vst.msk [vmem:[#allocation2] sm:$0xff] %vm63_vm0, %v61_v2  ;;  %707 = vmatprep.mubr.msk.f32.mxu0 %vm63_vm0, %v61_v2  ;;  %704 = vmatpush3.msra.mxu0 %v67_v0  ;;  %65 = vst.msk [vmem:[#allocation2 + $0x28] sm:$0xff] %vm63_vm0, %v62_v3  ;;  %v238_v5 = vld [vmem:[#allocation5] sm:$0xff]  ;;  %v410_v18 = vld [vmem:[%s966_s4 + $0x10] sm:$0xff] }
  0x27   :  { %705 = vmatprep.subr.mxu0 %v66_v1  ;;  %711 = vmatpush3.msra.mxu1 %v67_v0  ;;  %v404_v16 = vld [vmem:[%s965_s3] sm:$0xff]  ;;  %v409_v20 = vld [vmem:[%s966_s4 + $0x8] sm:$0xff]  ;;  %v411_v21 = vld [vmem:[%s966_s4 + $0x18] sm:$0xff] }
  0x28   :  { %706 = vmatpush3.msra.mxu0 %v66_v1  ;;  %712 = vmatprep.subr.mxu1 %v66_v1  ;;  %v408_v17 = vld [vmem:[%s966_s4] sm:$0xff]  ;;  %v405_v38 = vld [vmem:[%s965_s3 + $0x8] sm:$0xff]  ;;  %v406_v39 = vld [vmem:[%s965_s3 + $0x10] sm:$0xff] }
  0x29   :  { %708 = vmatmul.mubr.msk.f32.vlgmr.msra.gmra.mxu0 %vm63_vm0, %v62_v3  ;;  %717 = vmatprep.subr.mxu0 %v239_v4  ;;  %v407_v40 = vld [vmem:[%s965_s3 + $0x18] sm:$0xff] }
  0x2a   :  { %718 = vmatpush3.msra.mxu0 %v239_v4  ;;  %713 = vmatpush3.msra.mxu1 %v66_v1 }
  0x2b   :  { %724 = vmatprep.subr.mxu1 %v239_v4  ;;  %719 = vmatprep.subr.mxu0 %v238_v5 }
  0x2c   :  { %720 = vmatpush3.msra.mxu0 %v238_v5  ;;  %769 = vset.pattern.permute.xlu0 %v840_v19 }
  0x2d   :  { %770 = vset.pattern.permute.xlu1 %v840_v19  ;;  %419 = vperm.xlu0 %769, %v408_v17   ;;  %v544_v35 = vld [vmem:[#allocation2 + $0x28] sm:$0xff]  ;;  %v412_v37 = vld [vmem:[#allocation2] sm:$0xff] }
  0x2e   :  { %429 = vperm.xlu1 %770, %v410_v18  }
  0x31   :  { %424 = vperm.xlu0 %769, %v409_v20  }
  0x32   :  { %434 = vperm.xlu1 %770, %v411_v21  }
  0xa8   :  { %v420_v41 = vpop.permute.xlu0 %419 }
  0xa9   :  { %v430_v42 = vpop.permute.xlu1 %429 }
  0xac   :  { %v425_v43 = vpop.permute.xlu0 %424 }
  0xad   :  { %v435_v46 = vpop.permute.xlu1 %434 }
  0xe9   :  { %v709_v6 = vpop.f32.mrf.mxu0 }
  0xea   :  { %150 = vst.msk [vmem:[#allocation2 + $0x30] sm:$0xff] %vm63_vm0, %v709_v6 }
  0xeb   :  { %v140_v7 = vpop.f32.mrf.mxu0 }
  0xec   :  { %149 = vst.msk [vmem:[#allocation2 + $0x8] sm:$0xff] %vm63_vm0, %v140_v7  ;;  %714 = vmatprep.mubr.msk.f32.mxu1 %vm63_vm0, %v140_v7  ;;  %721 = vmatprep.mubr.msk.f32.mxu0 %vm63_vm0, %v140_v7 }
  0xed   :  { %715 = vmatmul.mubr.msk.f32.vlgmr.msra.gmra.mxu1 %vm63_vm0, %v709_v6  ;;  %722 = vmatmul.mubr.msk.f32.vlgmr.msra.gmra.mxu0 %vm63_vm0, %v709_v6 }
  0xee   :  { %725 = vmatpush3.msra.mxu1 %v239_v4  ;;  %741 = vmatprep.mubr.msk.f32.mxu0 %vm437_vm1, %v404_v16 }
  0xef   :  { %726 = vmatprep.subr.mxu1 %v238_v5 }
  0xf0   :  { %727 = vmatpush3.msra.mxu1 %v238_v5 }
  0xf1   :  { %v545_v34 = vld [vmem:[#allocation2 + $0x30] sm:$0xff] }
  0xf3   :  { %v413_v36 = vld [vmem:[#allocation2 + $0x8] sm:$0xff] }
 0x1ad   :  { %v716_v8 = vpop.f32.mrf.mxu1  ;;  %v723_v9 = vpop.f32.mrf.mxu0 }
 0x1ae   :  { %v233_v10 = vmul.f32 2.0, %v716_v8  ;;  %316 = vst.msk [vmem:[#allocation2 + $0x40] sm:$0xff] %vm63_vm0, %v723_v9 }
 0x1af   :  { %v223_v11 = vpop.f32.mrf.mxu1  ;;  %v306_v12 = vpop.f32.mrf.mxu0 }
 0x1b0   :  { %v235_v13 = vsub.f32 %v233_v10, %v62_v3  ;;  %v232_v14 = vmul.f32 2.0, %v223_v11  ;;  %315 = vst.msk [vmem:[#allocation2 + $0x18] sm:$0xff] %vm63_vm0, %v306_v12  ;;  %728 = vmatprep.mubr.msk.f32.mxu1 %vm63_vm0, %v306_v12 }
 0x1b1   :  { %729 = vmatmul.mubr.msk.f32.vlgmr.msra.gmra.mxu1 %vm63_vm0, %v723_v9 }
 0x1b2   :  { %237 = vst.msk [vmem:[#allocation2 + $0x38] sm:$0xff] %vm63_vm0, %v235_v13  ;;  %v234_v15 = vsub.f32 %v232_v14, %v61_v2  ;;  %757 = vmatprep.mubr.msk.f32.mxu1 %vm437_vm1, %v404_v16 }
 0x1b4   :  { %236 = vst.msk [vmem:[#allocation2 + $0x10] sm:$0xff] %vm63_vm0, %v234_v15 }
 0x1b5   :  { %v547_v30 = vld [vmem:[#allocation2 + $0x40] sm:$0xff] }
 0x1b7   :  { %v415_v31 = vld [vmem:[#allocation2 + $0x18] sm:$0xff] }
 0x1b9   :  { %v546_v32 = vld [vmem:[#allocation2 + $0x38] sm:$0xff] }
 0x1bb   :  { %v414_v33 = vld [vmem:[#allocation2 + $0x10] sm:$0xff] }
 0x271   :  { %v730_v22 = vpop.f32.mrf.mxu1 }
 0x272   :  { %v399_v23 = vmul.f32 2.0, %v730_v22 }
 0x273   :  { %v389_v24 = vpop.f32.mrf.mxu1 }
 0x274   :  { %v401_v25 = vsub.f32 %v399_v23, %v709_v6  ;;  %v398_v26 = vmul.f32 2.0, %v389_v24 }
 0x276   :  { %403 = vst.msk [vmem:[#allocation2 + $0x48] sm:$0xff] %vm63_vm0, %v401_v25  ;;  %v400_v27 = vsub.f32 %v398_v26, %v140_v7 }
 0x278   :  { %402 = vst.msk [vmem:[#allocation2 + $0x20] sm:$0xff] %vm63_vm0, %v400_v27 }
 0x27d   :  { %v548_v28 = vld [vmem:[#allocation2 + $0x48] sm:$0xff] }
 0x27e   :  { %747 = vmatprep.subr.mxu1 %v548_v28 }
 0x27f   :  { %748 = vmatpush3.msra.mxu1 %v548_v28  ;;  %v416_v29 = vld [vmem:[#allocation2 + $0x20] sm:$0xff] }
 0x280   :  { %731 = vmatprep.subr.mxu0 %v416_v29  ;;  %749 = vmatprep.subr.mxu1 %v547_v30 }
 0x281   :  { %732 = vmatpush3.msra.mxu0 %v416_v29  ;;  %750 = vmatpush3.msra.mxu1 %v547_v30 }
 0x282   :  { %733 = vmatprep.subr.mxu0 %v415_v31  ;;  %751 = vmatprep.subr.mxu1 %v546_v32 }
 0x283   :  { %734 = vmatpush3.msra.mxu0 %v415_v31  ;;  %752 = vmatpush3.msra.mxu1 %v546_v32 }
 0x284   :  { %735 = vmatprep.subr.mxu0 %v414_v33  ;;  %753 = vmatprep.subr.mxu1 %v545_v34 }
 0x285   :  { %736 = vmatpush3.msra.mxu0 %v414_v33  ;;  %754 = vmatpush3.msra.mxu1 %v545_v34 }
 0x286   :  { %737 = vmatprep.subr.mxu0 %v413_v36  ;;  %755 = vmatprep.subr.mxu1 %v544_v35 }
 0x287   :  { %738 = vmatpush3.msra.mxu0 %v413_v36  ;;  %756 = vmatpush3.msra.mxu1 %v544_v35 }
 0x288   :  { %739 = vmatprep.subr.mxu0 %v412_v37  ;;  %758 = vmatmul.mubr.msk.f32.vlgmr.msra.gmra.mxu1 %vm437_vm1, %v405_v38 }
 0x289   :  { %740 = vmatpush3.msra.mxu0 %v412_v37  ;;  %760 = vmatprep.mubr.msk.f32.mxu1 %vm437_vm1, %v406_v39 }
 0x28a   :  { %742 = vmatmul.mubr.msk.f32.vlgmr.msra.gmra.mxu0 %vm437_vm1, %v405_v38 }
 0x28b   :  { %744 = vmatprep.mubr.msk.f32.mxu0 %vm437_vm1, %v406_v39 }
 0x28c   :  { %761 = vmatmul.mubr.msk.f32.gmra.mxu1 %vm437_vm1, %v407_v40 }
 0x28e   :  { %745 = vmatmul.mubr.msk.f32.gmra.mxu0 %vm437_vm1, %v407_v40 }
 0x348   :  { %v759_v44 = vpop.f32.mrf.mxu1 }
 0x349   :  { %v621_v45 = vadd.f32 %v759_v44, %v425_v43 }
 0x34a   :  { %v743_v47 = vpop.f32.mrf.mxu0  ;;  %v615_v48 = vpop.f32.mrf.mxu1 }
 0x34b   :  { %v635_v49 = vmax.f32 %v621_v45, 0.0  ;;  %v522_v50 = vadd.f32 %v743_v47, %v425_v43  ;;  %v616_v51 = vadd.f32 %v615_v48, %v420_v41 }
 0x34c   :  { %v516_v52 = vpop.f32.mrf.mxu0  ;;  %v762_v53 = vpop.f32.mrf.mxu1 }
 0x34d   :  { %666 = vst.msk [vmem:[%s967_s5 + $0x28] sm:$0xff] %vm63_vm0, %v635_v49  ;;  %v536_v54 = vmax.f32 %v522_v50, 0.0  ;;  %v634_v55 = vmax.f32 %v616_v51, 0.0  ;;  %v517_v56 = vadd.f32 %v516_v52, %v420_v41  ;;  %v631_v57 = vadd.f32 %v762_v53, %v435_v46 }
 0x34e   :  { %v746_v58 = vpop.f32.mrf.mxu0  ;;  %v625_v59 = vpop.f32.mrf.mxu1 }
 0x34f   :  { %540 = vst.msk [vmem:[%s967_s5 + $0x8] sm:$0xff] %vm63_vm0, %v536_v54  ;;  %665 = vst.msk [vmem:[%s967_s5 + $0x20] sm:$0xff] %vm63_vm0, %v634_v55  ;;  %v535_v60 = vmax.f32 %v517_v56, 0.0  ;;  %v637_v61 = vmax.f32 %v631_v57, 0.0  ;;  %v532_v62 = vadd.f32 %v746_v58, %v435_v46  ;;  %v626_v63 = vadd.f32 %v625_v59, %v430_v42 }
 0x350   :  { %v526_v0 = vpop.f32.mrf.mxu0 }
 0x351   :  { %539 = vst.msk [vmem:[%s967_s5] sm:$0xff] %vm63_vm0, %v535_v60  ;;  %668 = vst.msk [vmem:[%s967_s5 + $0x38] sm:$0xff] %vm63_vm0, %v637_v61  ;;  %v538_v1 = vmax.f32 %v532_v62, 0.0  ;;  %v636_v2 = vmax.f32 %v626_v63, 0.0  ;;  %v527_v3 = vadd.f32 %v526_v0, %v430_v42 }
 0x353   :  { %542 = vst.msk [vmem:[%s967_s5 + $0x18] sm:$0xff] %vm63_vm0, %v538_v1  ;;  %667 = vst.msk [vmem:[%s967_s5 + $0x30] sm:$0xff] %vm63_vm0, %v636_v2  ;;  %v537_v4 = vmax.f32 %v527_v3, 0.0 }
 0x355   :  { %541 = vst.msk [vmem:[%s967_s5 + $0x10] sm:$0xff] %vm63_vm0, %v537_v4 }
 0x356   :  { %647 = vsyncpa [#allocation4], 1 }
 0x357   :  { %648 = vsyncpa [#allocation6], 1 }

</bundles_post_ra>
